<compile_context>
chip_gen: v5e
topology: v5e:2x2
jax: 0.10.0
libtpu: 0.0.40
codegen_flags: <defaults>
</compile_context>

<pallas_src>
import functools

import jax
import jax.numpy as jnp
from jax.experimental import pallas as pl
from jax.experimental.pallas import tpu as pltpu


# --------------------------------------------------------------------------
# Hardware budgets
# --------------------------------------------------------------------------
def _round_up(x, m):
    return (x + m - 1) // m * m


def _vmem_budget_bytes():
    """Per-generation (vmem_limit_bytes, max_input_block_bytes)."""
    cap = 64 << 20  # conservative default = v7x per-TC VMEM
    try:
        info = pltpu.get_tpu_info()
        c = int(getattr(info, "vmem_capacity_bytes", 0) or 0)
        if c > 0:
            cap = c
    except Exception:
        pass
    vmem_limit = int(cap * 3 // 4)      # v7x: 48 MiB, v5e/v6e: 96 MiB
    max_block = vmem_limit // 8         # v7x: ~6 MiB, v5e/v6e: ~12 MiB
    return vmem_limit, max_block


def _pick_spatial_tile(S, N, C, itemsize, vmem_limit, max_block_bytes,
                       min_steps=8):
    """Largest lane-axis tile that (a) fits the VMEM budget with sublane
    padding and f32 temporaries accounted for, (b) leaves >= min_steps grid
    steps, and (c) preferably divides S evenly (no masked tail stores)."""
    pack = max(1, 32 // itemsize)              # sublane pack: 8 f32 / 16 bf16 / 32 i8
    c_pad = _round_up(C, pack)
    # Per lane-column cost: double-buffered in + out blocks in source dtype
    # plus ~3 full-tile f32 temporaries (upcast, centered x, x*a).
    bytes_per_col = c_pad * (4 * itemsize + 3 * 4)
    cap_vmem = max(128, int(vmem_limit * 0.85) // bytes_per_col)
    cap_block = max(128, max_block_bytes // (c_pad * itemsize))
    # Enough grid steps for megacore sharding (v7x: 2 TCs) + pipelining.
    target_s_tiles = -(-min_steps // max(1, N))
    if target_s_tiles > 1:
        cap_steps = max(128, (S // target_s_tiles) // 128 * 128)
    else:
        cap_steps = S
    cap = min(cap_vmem, cap_block, cap_steps)
    if S <= cap:
        return S                               # full extent: always legal
    cap = max(128, (cap // 128) * 128)
    # Prefer an evenly dividing 128-multiple within a 2x window of the cap.
    t = cap
    while t >= max(128, cap // 2):
        if S % t == 0:
            return t
        t -= 128
    return cap


# --------------------------------------------------------------------------
# Kernels
# --------------------------------------------------------------------------
def _ln_kernel(x_ref, g_ref, b_ref, o_ref, *, eps, inv_c):
    """Single-pass path: full C in sublanes, centered mean/variance."""
    x = x_ref[...].astype(jnp.float32)                    # (C, ts) f32 working copy
    mean = jnp.sum(x, axis=0, keepdims=True) * inv_c      # (1, ts)
    xc = x - mean
    var = jnp.sum(xc * xc, axis=0, keepdims=True) * inv_c
    inv = jax.lax.rsqrt(var + eps)                        # (1, ts), EUP
    a = inv * g_ref[...]                                  # (C, ts): fold scale into gamma
    o_ref[...] = (xc * a + b_ref[...]).astype(o_ref.dtype)


def _ln_stats_kernel(x_ref, mean_ref, inv_ref, *, eps, inv_c, c_chunk,
                     n_channels):
    """Large-C fallback pass 1: accumulate sum / sum-of-squares over channel
    chunks (grid axis 2, 'arbitrary'); finalize mean and rsqrt on last chunk."""
    c = pl.program_id(2)

    @pl.when(c == 0)
    def _():
        mean_ref[...] = jnp.zeros_like(mean_ref)
        inv_ref[...] = jnp.zeros_like(inv_ref)

    x = x_ref[...].astype(jnp.float32)                    # (cc, ts)
    row = jax.lax.broadcasted_iota(jnp.int32, x.shape, 0) + c * c_chunk
    x = jnp.where(row < n_channels, x, 0.0)               # mask padded channel rows
    mean_ref[...] += jnp.sum(x, axis=0, keepdims=True)    # running sum(x)
    inv_ref[...] += jnp.sum(x * x, axis=0, keepdims=True)  # running sum(x^2)

    @pl.when(c == pl.num_programs(2) - 1)
    def _():
        m = mean_ref[...] * inv_c
        # Uncentered variance is unavoidable here; guard against cancellation.
        var = jnp.maximum(inv_ref[...] * inv_c - m * m, 0.0)
        mean_ref[...] = m
        inv_ref[...] = jax.lax.rsqrt(var + eps)


def _ln_apply_kernel(x_ref, mean_ref, inv_ref, g_ref, b_ref, o_ref):
    """Large-C fallback pass 2: elementwise normalize + affine."""
    x = x_ref[...].astype(jnp.float32)                    # (cc, ts)
    a = inv_ref[...] * g_ref[...]                         # (cc, ts)
    o_ref[...] = ((x - mean_ref[...]) * a + b_ref[...]).astype(o_ref.dtype)


# --------------------------------------------------------------------------
# Wrappers
# --------------------------------------------------------------------------
def layer_norm_channels(x3, gamma, beta, eps=1e-6, _force_c_chunk=None):
    """x3: (N, C, S); normalize every (n, :, s) column over the channel axis."""
    N, C, S = x3.shape
    itemsize = x3.dtype.itemsize
    pack = max(1, 32 // itemsize)
    c_pad = _round_up(C, pack)
    vmem_limit, max_block = _vmem_budget_bytes()

    # Affine params stay f32 (PyTorch applies f32 weights even to bf16 x).
    g = gamma.reshape(C, 1).astype(jnp.float32)
    b = beta.reshape(C, 1).astype(jnp.float32)

    min_c_block_bytes = c_pad * 128 * itemsize
    need_c_chunk = (_force_c_chunk is not None) or (min_c_block_bytes > max_block)

    if not need_c_chunk:
        ts = _pick_spatial_tile(S, N, C, itemsize, vmem_limit, max_block)
        grid = (N, pl.cdiv(S, ts))
        kernel = functools.partial(_ln_kernel, eps=float(eps), inv_c=1.0 / C)
        return pl.pallas_call(
            kernel,
            out_shape=jax.ShapeDtypeStruct((N, C, S), x3.dtype),
            grid_spec=pltpu.PrefetchScalarGridSpec(
                num_scalar_prefetch=0,
                grid=grid,
                in_specs=[
                    pl.BlockSpec((None, C, ts), lambda n, s: (n, 0, s)),
                    pl.BlockSpec((C, 1), lambda n, s: (0, 0)),
                    pl.BlockSpec((C, 1), lambda n, s: (0, 0)),
                ],
                out_specs=pl.BlockSpec((None, C, ts), lambda n, s: (n, 0, s)),
            ),
            compiler_params=pltpu.CompilerParams(
                dimension_semantics=("parallel", "parallel"),
                vmem_limit_bytes=vmem_limit,
            ),
        )(x3, g, b)

    # ---- Large-C fallback: chunk channels, two passes over x in HBM --------
    if _force_c_chunk is not None:
        cc = int(_force_c_chunk)
    else:
        cc = max(pack, (max_block // (128 * itemsize)) // pack * pack)
        cc = min(cc, c_pad)
    n_cc = pl.cdiv(C, cc)
    ts = _pick_spatial_tile(S, N, cc, itemsize, vmem_limit, max_block)
    grid = (N, pl.cdiv(S, ts), n_cc)

    stats_kernel = functools.partial(
        _ln_stats_kernel, eps=float(eps), inv_c=1.0 / C, c_chunk=cc,
        n_channels=C)
    mean, inv = pl.pallas_call(
        stats_kernel,
        out_shape=(jax.ShapeDtypeStruct((N, 1, S), jnp.float32),
                   jax.ShapeDtypeStruct((N, 1, S), jnp.float32)),
        grid_spec=pltpu.PrefetchScalarGridSpec(
            num_scalar_prefetch=0,
            grid=grid,
            in_specs=[pl.BlockSpec((None, cc, ts), lambda n, s, c: (n, c, s))],
            out_specs=(pl.BlockSpec((None, 1, ts), lambda n, s, c: (n, 0, s)),
                       pl.BlockSpec((None, 1, ts), lambda n, s, c: (n, 0, s))),
        ),
        compiler_params=pltpu.CompilerParams(
            dimension_semantics=("parallel", "parallel", "arbitrary"),
            vmem_limit_bytes=vmem_limit,
        ),
    )(x3)

    return pl.pallas_call(
        _ln_apply_kernel,
        out_shape=jax.ShapeDtypeStruct((N, C, S), x3.dtype),
        grid_spec=pltpu.PrefetchScalarGridSpec(
            num_scalar_prefetch=0,
            grid=grid,
            in_specs=[
                pl.BlockSpec((None, cc, ts), lambda n, s, c: (n, c, s)),
                pl.BlockSpec((None, 1, ts), lambda n, s, c: (n, 0, s)),
                pl.BlockSpec((None, 1, ts), lambda n, s, c: (n, 0, s)),
                pl.BlockSpec((cc, 1), lambda n, s, c: (c, 0)),
                pl.BlockSpec((cc, 1), lambda n, s, c: (c, 0)),
            ],
            out_specs=pl.BlockSpec((None, cc, ts), lambda n, s, c: (n, c, s)),
        ),
        compiler_params=pltpu.CompilerParams(
            dimension_semantics=("parallel", "parallel", "parallel"),
            vmem_limit_bytes=vmem_limit,
        ),
    )(x3, mean, inv, g, b)


def layer_norm_module(x, gamma, beta, eps=1e-6):
    """Forward of the PyTorch LayerNorm module. x: (N, C, *spatial), e.g. NCDHW."""
    N, C = x.shape[0], x.shape[1]
    S = 1
    for d in x.shape[2:]:
        S *= int(d)
    x3 = x.reshape(N, C, S)            # contiguous reshape: no HBM transpose
    y3 = layer_norm_channels(x3, gamma, beta, eps)
    return y3.reshape(x.shape)


# --------------------------------------------------------------------------
# Self-test
# --------------------------------------------------------------------------
if __name__ == "__main__":
    key = jax.random.PRNGKey(0)
    eps = 1e-6

    def reference(x, gamma, beta, eps):
        mean = jnp.mean(x, axis=1, keepdims=True)
        var = jnp.mean((x - mean) ** 2, axis=1, keepdims=True)
        shp = (1, x.shape[1]) + (1,) * (x.ndim - 2)
        return ((x - mean) * jax.lax.rsqrt(var + eps) * gamma.reshape(shp)
                + beta.reshape(shp))

    # --- main (full-C) path --------------------------------------------------
    N, C, D, H, W = 2, 4, 8, 8, 8
    k0, k1 = jax.random.split(key)
    x = jax.random.normal(k0, (N, C, D, H, W), dtype=jnp.float32)
    gamma = 1.0 + 0.1 * jnp.arange(C, dtype=jnp.float32)
    beta = 0.05 * jnp.arange(C, dtype=jnp.float32)

    y = jax.block_until_ready(layer_norm_module(x, gamma, beta, eps))
    ref = reference(x, gamma, beta, eps)
    assert y.shape == x.shape
    assert jnp.max(jnp.abs(y - ref)) < 1e-4

    # --- large-C fallback path (channel chunking), forced at small size ------
    N2, C2, D2, H2, W2 = 2, 16, 4, 8, 8
    x2 = jax.random.normal(k1, (N2, C2, D2, H2, W2), dtype=jnp.float32)
    gamma2 = 1.0 + 0.05 * jnp.arange(C2, dtype=jnp.float32)
    beta2 = 0.02 * jnp.arange(C2, dtype=jnp.float32)
    y2 = jax.block_until_ready(
        layer_norm_channels(x2.reshape(N2, C2, -1), gamma2, beta2, eps,
                            _force_c_chunk=8)
    ).reshape(x2.shape)
    ref2 = reference(x2, gamma2, beta2, eps)
    assert jnp.max(jnp.abs(y2 - ref2)) < 5e-4

    print("KERNEL_OK")
</pallas_src>

<mosaic_0001>
module attributes {stable_mosaic.version = 11 : i64} {
  func.func @_ln_kernel(%arg0: i32, %arg1: i32, %arg2: memref<1x4x128xf32, #tpu.memory_space<vmem>>, %arg3: memref<4x1xf32, #tpu.memory_space<vmem>>, %arg4: memref<4x1xf32, #tpu.memory_space<vmem>>, %arg5: memref<1x4x128xf32, #tpu.memory_space<vmem>>) attributes {dimension_semantics = [#tpu.dimension_semantics<parallel>, #tpu.dimension_semantics<parallel>], iteration_bounds = array<i64: 2, 4>, scalar_prefetch = 0 : i64, scratch_operands = 0 : i64, tpu.core_type = #tpu.core_type<tc>, window_params = [{transform_indices = @transform_0, window_bounds = array<i64: 1, 4, 128>}, {pipeline_mode = #tpu.pipeline_mode<synchronous>, transform_indices = @transform_1, window_bounds = array<i64: 4, 1>}, {pipeline_mode = #tpu.pipeline_mode<synchronous>, transform_indices = @transform_2, window_bounds = array<i64: 4, 1>}, {transform_indices = @transform_3, window_bounds = array<i64: 1, 4, 128>}]} {
    %c0 = arith.constant 0 : index
    %c0_0 = arith.constant 0 : index
    %c0_1 = arith.constant 0 : index
    %0 = vector.load %arg2[%c0, %c0_0, %c0_1] : memref<1x4x128xf32, #tpu.memory_space<vmem>>, vector<1x4x128xf32>
    %1 = vector.shape_cast %0 : vector<1x4x128xf32> to vector<4x128xf32>
    %cst = arith.constant dense<0.000000e+00> : vector<128xf32>
    %2 = vector.multi_reduction <add>, %1, %cst [0] : vector<4x128xf32> to vector<128xf32>
    %3 = vector.shape_cast %2 : vector<128xf32> to vector<1x128xf32>
    %cst_2 = arith.constant 2.500000e-01 : f32
    %4 = vector.broadcast %cst_2 : f32 to vector<1x128xf32>
    %5 = arith.mulf %3, %4 : vector<1x128xf32>
    %6 = vector.broadcast %5 : vector<1x128xf32> to vector<4x128xf32>
    %7 = arith.subf %1, %6 : vector<4x128xf32>
    %8 = arith.mulf %7, %7 : vector<4x128xf32>
    %cst_3 = arith.constant dense<0.000000e+00> : vector<128xf32>
    %9 = vector.multi_reduction <add>, %8, %cst_3 [0] : vector<4x128xf32> to vector<128xf32>
    %10 = vector.shape_cast %9 : vector<128xf32> to vector<1x128xf32>
    %cst_4 = arith.constant 2.500000e-01 : f32
    %11 = vector.broadcast %cst_4 : f32 to vector<1x128xf32>
    %12 = arith.mulf %10, %11 : vector<1x128xf32>
    %cst_5 = arith.constant 9.99999997E-7 : f32
    %13 = vector.broadcast %cst_5 : f32 to vector<1x128xf32>
    %14 = arith.addf %12, %13 : vector<1x128xf32>
    %15 = math.rsqrt %14 : vector<1x128xf32>
    %c0_6 = arith.constant 0 : index
    %c0_7 = arith.constant 0 : index
    %16 = vector.load %arg3[%c0_6, %c0_7] : memref<4x1xf32, #tpu.memory_space<vmem>>, vector<4x1xf32>
    %17 = vector.broadcast %15 : vector<1x128xf32> to vector<4x128xf32>
    %18 = vector.broadcast %16 : vector<4x1xf32> to vector<4x128xf32>
    %19 = arith.mulf %17, %18 : vector<4x128xf32>
    %20 = arith.mulf %7, %19 : vector<4x128xf32>
    %c0_8 = arith.constant 0 : index
    %c0_9 = arith.constant 0 : index
    %21 = vector.load %arg4[%c0_8, %c0_9] : memref<4x1xf32, #tpu.memory_space<vmem>>, vector<4x1xf32>
    %22 = vector.broadcast %21 : vector<4x1xf32> to vector<4x128xf32>
    %23 = arith.addf %20, %22 : vector<4x128xf32>
    %c0_10 = arith.constant 0 : index
    %c0_11 = arith.constant 0 : index
    %c0_12 = arith.constant 0 : index
    %24 = vector.load %arg5[%c0_10, %c0_11, %c0_12] : memref<1x4x128xf32, #tpu.memory_space<vmem>>, vector<1x4x128xf32>
    %25 = vector.shape_cast %24 : vector<1x4x128xf32> to vector<4x128xf32>
    %26 = vector.shape_cast %23 : vector<4x128xf32> to vector<1x4x128xf32>
    tpu.vector_store %arg5[%c0_10, %c0_11, %c0_12], %26 {strides = array<i32>} : memref<1x4x128xf32, #tpu.memory_space<vmem>>, vector<1x4x128xf32>,
    return
  }
  func.func @transform_0(%arg0: i32, %arg1: i32) -> (i32, i32, i32) {
    %c0_i32 = arith.constant 0 : i32
    %c0_i32_0 = arith.constant 0 : i32
    return %arg0, %c0_i32, %arg1 : i32, i32, i32
  }
  func.func @transform_1(%arg0: i32, %arg1: i32) -> (i32, i32) {
    %c0_i32 = arith.constant 0 : i32
    %c0_i32_0 = arith.constant 0 : i32
    %c0_i32_1 = arith.constant 0 : i32
    return %c0_i32, %c0_i32_0 : i32, i32
  }
  func.func @transform_2(%arg0: i32, %arg1: i32) -> (i32, i32) {
    %c0_i32 = arith.constant 0 : i32
    %c0_i32_0 = arith.constant 0 : i32
    %c0_i32_1 = arith.constant 0 : i32
    return %c0_i32, %c0_i32_0 : i32, i32
  }
  func.func @transform_3(%arg0: i32, %arg1: i32) -> (i32, i32, i32) {
    %c0_i32 = arith.constant 0 : i32
    %c0_i32_0 = arith.constant 0 : i32
    return %arg0, %c0_i32, %arg1 : i32, i32, i32
  }
}

</mosaic_0001>

<bundles_post_ra>
// kernel: tpu_custom_call.1
= control target key start
LH: loop header
LB: loop body
LE: loop exit
PB: predicated region body
PF: predicated region fallthrough
CT: control target
= control target key end

     0   :  { %8 = vsyncpa [#allocation3], 0  ;;  %s756_s0 = inlined_call_operand.hbm [shape: f32[2,4,512], index: 0, kind: input, shape index: {}]   ;;  %s757_s1 = inlined_call_operand.vmem [shape: f32[4,1], index: 1, kind: input, shape index: {}]   ;;  %s758_s2 = inlined_call_operand.vmem [shape: f32[4,1], index: 2, kind: input, shape index: {}]   ;;  %s759_s3 = inlined_call_operand.hbm [shape: f32[2,4,512], index: 3, kind: output, shape index: {}]  }
   0x1   :  { %10 = vsyncpa [#allocation3 + $0x1], 0 }
   0x2   :  { %11 = vsyncpa [#allocation4], 0 }
   0x3   :  { %13 = vsyncpa [#allocation4 + $0x1], 0  ;;  %s604_s12 = smov 0   ;;  %s606_s13 = smov 0  }
   0x4   :  { %s608_s14 = smov 0   ;;  %s610_s15 = smov 0  }
   0x5   :  { %s612_s16 = smov 0   ;;  %s614_s17 = smov 0  }
   0x6   :  { %s616_s18 = smov 0   ;;  %s618_s19 = smov 0  }
   0x7 LB: > { %s356_s20 = sadd.s32 4294967295, %s581_s19   ;;  %s357_s21 = sadd.s32 4294967294, %s581_s19   ;;  %s581_s19 = sphi %s618_s19, %s19_s19   ;;  %s577_s18 = sphi %s616_s18, %s773_s18   ;;  %s573_s17 = sphi %s614_s17, %s772_s17   ;;  %s569_s16 = sphi %s612_s16, %s771_s16   ;;  %s565_s15 = sphi %s610_s15, %s770_s15   ;;  %s561_s14 = sphi %s608_s14, %s769_s14   ;;  %s557_s13 = sphi %s606_s13, %s768_s13   ;;  %s553_s12 = sphi %s604_s12, %s767_s12  }
   0x8   : > { %s28_s22 = sadd.s32 1, %s573_s17  ;;  %s31_s23 = sadd.s32 1, %s577_s18 }
   0x9   : > { %p29_p0 = scmp.ge.s32.totalorder %s28_s22, 4  ;;  %s40_s24 = sadd.s32 1, %s561_s14 }
   0xa   : > { %p47_p1 = scmp.ne.s32.totalorder %s561_s14, %s557_s13  ;;  %p48_p2 = scmp.eq.s32.totalorder %s581_s19, 0 }
   0xb   : > { %s775_s22 = smov (%p29_p0, %s28_s22), 0  ;;  %s777_s23 = smov (!%p29_p0, %s31_s23), %s577_s18 }
   0xc   : > { %s36_s25 = ssub.s32 %s573_s17, %s775_s22  ;;  %p657_p3 = por %p48_p2, %p47_p1 }
   0xd   : > { %p33_p4 = scmp.ge.s32.totalorder %s777_s23, 2  ;;  %p53_p5 = scmp.ne.s32.totalorder %s557_s13, %s553_s12 }
   0xe   : > { %p54_p6 = scmp.eq.s32.totalorder %s356_s20, 0  ;;  %p121_p7 = scmp.eq.s32.totalorder %s356_s20, 7 }
   0xf   : > { %s779_s23 = smov (%p33_p4, %s777_s23), 0  ;;  %p127_p10 = scmp.eq.s32.totalorder %s357_s21, 7 }
  0x10   : > { %762 = sst [smem:[#allocation8_spill]] %s779_s23  ;;  %p665_p8 = por %p54_p6, %p53_p5 }
  0x11   : > { %p669_p9 = por %p121_p7, %p47_p1  ;;  %s35_s29 = ssub.s32 %s577_s18, %s779_s23 }
  0x12   : > { %s37_s30 = sor.u32 %s36_s25, %s35_s29  ;;  %p675_p12 = por %p127_p10, %p53_p5 }
  0x13   : > { %p38_p11 = scmp.eq.s32.totalorder %s37_s30, 0  ;;  %p383_p13 = scmp.lt.s32.totalorder %s581_s19, 8 }
  0x14   : > { %s153_s5 = sand.u32 1, %s561_s14   ;;  %s361_s8 = sshll.u32 %s577_s18, 2 }
  0x15   : > { %s682_s6 = scalar_select %p38_p11, %s561_s14, %s40_s24  }
  0x16   : > { %s360_s7 = sshll.u32 %s153_s5, 2  ;;  %s161_s9 = sadd.s32 %s573_s17, %s361_s8 }
  0x17   : > { %s157_s10 = scalar_lea.vmem [#allocation2], %s360_s7  ;;  %s362_s20 = sshll.u32 %s161_s9, 2 }
  0x18   : > { %s167_s11 = sshll.u32 %s157_s10, 4  ;;  %s163_s29 = scalar_lea.hbm %s756_s0, %s362_s20  ;;  %s168_s11 = int_to_ptr.vmem [resolvable:$true] %s167_s11 }
  0x19   : > { %p376_p0 = pnand %p383_p13, %p657_p3  ;;  %s165_s30 = sshll.u32 %s163_s29, 4  ;;  %s166_s30 = int_to_ptr.hbm [resolvable:$true] %s165_s30 }
  0x1a   : > { %p363_p1 = scmp.ge.s32.totalorder %s581_s19, 1  ;;  %s154_s23 = scalar_lea.sflag [#allocation3], %s153_s5 }
  0x1b   : > { %378 = dma.hbm_to_vmem [thread:$0]  (!%p376_p0), %s166_s30, 64, %s168_s11, %s154_s23  }
  0x1c   : > { %p172_p2 = scmp.lt.s32.totalorder %s581_s19, 9 }
  0x1e   : > { %p173_p4 = pnand %p363_p1, %p172_p2 }
  0x1f   : > { %s694_s24 = sand.u32 (!%p173_p4), 1, %s557_s13  }
  0x20   : > { %176 = sbr.rel (%p173_p4) target bundleno = 168 (0xa8), region = 32  ;;  %s364_s7 = sshll.u32 (!%p173_p4), %s694_s24, 2 }
  0x21   : > { %s179_s8 = scalar_lea.sflag (!%p173_p4), [#allocation3], %s694_s24  ;;  %s182_s26 = scalar_lea.vmem (!%p173_p4), [#allocation2], %s364_s7 }
  0x25   : > { %544 = dma.done.wait (%p665_p8), %s179_s8, 64  }
  0x26   : > { %546 = vsyncadd (%p665_p8), %s179_s8, 4294967232  ;;  %v583_v0 = vmov 0   ;;  %v237_v1 = vld [vmem:[%s757_s1] sm:$0xf]  ;;  %vm207_vm0 = vcmask 1043456   ;;  %s367_s27 = sshll.u32 %s569_s16, 2 }
  0x27   : > { %450 = vset.pattern.permute.xlu0 %v583_v0  ;;  %v245_v2 = vld [vmem:[%s758_s2] sm:$0xf]  ;;  %s264_s11 = sadd.s32 %s565_s15, %s367_s27  ;;  %s205_s30 = scalar_lea.vmem [#allocation5], %s364_s7 }
  0x28   : > { %240 = vperm.xlu0 %450, %v237_v1   ;;  %v206_v3 = vld [vmem:[%s182_s26] sm:$0xf]  ;;  %s368_s20 = sshll.u32 %s264_s11, 2  ;;  %s268_s8 = sshll.u32 %s205_s30, 4  ;;  %s269_s8 = int_to_ptr.vmem [resolvable:$true] %s268_s8 }
  0x29   : > { %v208_v4 = vsel %vm207_vm0, %v206_v3, 0.0  ;;  %s266_s29 = scalar_lea.hbm %s759_s3, %s368_s20  ;;  %s254_s15 = scalar_lea.sflag [#allocation4], %s694_s24 }
  0x2a   : > { %v209_v5 = vrot.slane %v208_v4, 4  ;;  %s270_s26 = sshll.u32 %s266_s29, 4  ;;  %s503_s7 = scalar_lea.hbm %s759_s3, 32  ;;  %s271_s26 = int_to_ptr.hbm [resolvable:$true] %s270_s26 }
  0x2b   : > { %s497_s16 = sshra.s32 %s271_s26, 4  ;;  %s498_s16 = int_to_ptr.hbm [resolvable:$true] %s497_s16 }
  0x2c   : > { %v210_v6 = vadd.f32 %v209_v5, %v208_v4  ;;  %s499_s23 = scalar_lea.hbm %s498_s16, 4  ;;  %p504_p7 = scmp.lt.s32.totalorder %s498_s16, %s759_s3 }
  0x2d   : > { %p500_p3 = scmp.ne.s32.totalorder %s498_s16, %s499_s23  ;;  %p505_p8 = scmp.lt.s32.totalorder %s503_s7, %s499_s23 }
  0x2e   : > { %v211_v7 = vrot.slane %v210_v6, 2 }
  0x2f   : > { %p501_p5 = pnand %p500_p3, %p669_p9  ;;  %p506_p10 = por %p505_p8, %p504_p7 }
  0x30   : > { %248 = vperm.xlu0 %450, %v245_v2   ;;  %v212_v8 = vadd.f32 %v211_v7, %v210_v6 }
  0x31   : > { %p502_p6 = pneg %p501_p5 }
  0x32   : > { %v213_v9 = vrot.slane %v212_v8, 1 }
  0x33   : > { %p507_p11 = pnand %p506_p10, %p502_p6 }
  0x34   : > { %v214_v10 = vadd.f32 %v213_v9, %v212_v8 }
  0x36   : > { %v215_v11 = vmul.f32 0.25, %v214_v10 }
  0x38   : > { %v216_v12 = vsub.f32 %v206_v3, %v215_v11 }
  0x3a   : > { %v217_v13 = vmul.f32 %v216_v12, %v216_v12 }
  0x3c   : > { %v218_v14 = vsel %vm207_vm0, %v217_v13, 0.0 }
  0x3d   : > { %v219_v15 = vrot.slane %v218_v14, 4 }
  0x3f   : > { %v220_v16 = vadd.f32 %v219_v15, %v218_v14 }
  0x41   : > { %v221_v17 = vrot.slane %v220_v16, 2 }
  0x43   : > { %v222_v18 = vadd.f32 %v221_v17, %v220_v16 }
  0x45   : > { %v223_v19 = vrot.slane %v222_v18, 1 }
  0x47   : > { %v224_v20 = vadd.f32 %v223_v19, %v222_v18 }
  0x49   : > { %v225_v21 = vmul.f32 0.25, %v224_v20 }
  0x4b   : > { %v226_v22 = vadd.f32 1e-06, %v225_v21 }
  0x4d   : > { %451 = vrsqrt.f32 %v226_v22  ;;  %vm233_vm1 = vweird.f32 %v226_v22 }
  0x53   : > { %v452_v23 = vpop.eup %451 }
  0x54   : > { %v228_v24 = vmul.f32 %v452_v23, %v226_v22  ;;  %vm234_vm2 = vweird.f32 %v452_v23 }
  0x55   : > { %vm235_vm3 = vmor %vm233_vm1, %vm234_vm2 }
  0x56   : > { %v229_v25 = vmul.f32 %v452_v23, %v228_v24 }
  0x58   : > { %v230_v26 = vmul.f32 0.5, %v229_v25 }
  0x5a   : > { %v231_v27 = vsub.f32 1.5, %v230_v26 }
  0x5c   : > { %v232_v28 = vmul.f32 %v452_v23, %v231_v27 }
  0x5e   : > { %v236_v30 = vsel %vm235_vm3, %v452_v23, %v232_v28 }
  0x9a   : > { %v241_v29 = vpop.permute.xlu0 %240 }
  0x9b   : > { %v243_v31 = vmul.f32 %v241_v29, %v236_v30 }
  0x9d   : > { %v244_v32 = vmul.f32 %v243_v31, %v216_v12 }
  0xa2   : > { %v249_v33 = vpop.permute.xlu0 %248 }
  0xa3   : > { %v251_v34 = vadd.f32 %v249_v33, %v244_v32 }
  0xa5   : > { %252 = vst [vmem:[%s205_s30] sm:$0xf] %v251_v34 }
  0xa6   : > { %510 = shalt.err (!%p507_p11)
}
  0xa7   : > { %373 = dma.vmem_to_hbm [thread:$0]  (%p669_p9), %s269_s8, 64, %s271_s26, %s254_s15  }
  0xa8 PF: > { %p384_p13 = scmp.ge.s32.totalorder %s581_s19, 2  ;;  %s282_s24 = sand.u32 1, %s553_s12  }
  0xa9   : > { %s283_s11 = scalar_lea.sflag [#allocation4], %s282_s24 }
  0xaa   : > { %p380_p0 = pnand %p384_p13, %p675_p12 }
  0xac   : > { %p381_p1 = pneg %p380_p0 }
  0xae   : > { %548 = dma.done.wait (%p381_p1), %s283_s11, 64  }
  0xaf   : > { %550 = vsyncadd (%p381_p1), %s283_s11, 4294967232  ;;  %s19_s19 = sadd.s32 1, %s581_s19   ;;  %s766_s28 = sld [smem:[#allocation8_spill]] }
  0xb0   : > { %p16_p2 = scmp.ge.s32.totalorder %s19_s19, 10   ;;  %s767_s12 = smov %s557_s13 }
  0xb1   : > { %s768_s13 = smov %s561_s14  ;;  %s769_s14 = smov %s682_s6 }
  0xb2   : > { %s770_s15 = smov %s573_s17  ;;  %s771_s16 = smov %s577_s18 }
  0xb3   : > { %s772_s17 = smov %s775_s22  ;;  %18 = sbr.rel (!%p16_p2) target bundleno = 7 (0x7), region = 77 }
  0xb5   : > { %s773_s18 = smov %s766_s28 }
  0xb8   :  { %289 = vsyncpa [#allocation3], 1 }
  0xb9   :  { %291 = vsyncpa [#allocation3 + $0x1], 1 }
  0xba   :  { %292 = vsyncpa [#allocation4], 1 }
  0xbb   :  { %294 = vsyncpa [#allocation4 + $0x1], 1 }

</bundles_post_ra>
